<compile_context>
chip_gen: v6e
topology: v6e:2x2x1
jax: 0.10.0
libtpu: 0.0.40
codegen_flags: <defaults>
</compile_context>

<pallas_src>
import functools

import jax
import jax.numpy as jnp
from jax.experimental import pallas as pl
from jax.experimental.pallas import tpu as pltpu

INPUT_DIM = 22
HIDDEN_DIM = 64
OUT_DIM = 2
OUT_SLAB = 2 * HIDDEN_DIM  # 128-wide lane-dense output slab: [h | padded logp]
NEG_BIG = -1e30            # padding bias for unused logit columns


def _round_up(x, m):
    return ((x + m - 1) // m) * m


# ---------------------------------------------------------------------------
# Stage 1: XW = X @ W_gcn (N x 22 @ 22 x 64), emitted in bf16.
# ---------------------------------------------------------------------------
def _xw_kernel(x_ref, w_ref, xw_ref):
    xw_ref[...] = jnp.dot(
        x_ref[...], w_ref[...], preferred_element_type=jnp.float32
    ).astype(xw_ref.dtype)


def _compute_xw(x_pad, w_gcn, tk):
    k_pad = x_pad.shape[0]
    return pl.pallas_call(
        _xw_kernel,
        grid=(k_pad // tk,),
        in_specs=[
            pl.BlockSpec((tk, INPUT_DIM), lambda i: (i, 0)),
            pl.BlockSpec((INPUT_DIM, HIDDEN_DIM), lambda i: (0, 0)),
        ],
        out_specs=pl.BlockSpec((tk, HIDDEN_DIM), lambda i: (i, 0)),
        out_shape=jax.ShapeDtypeStruct((k_pad, HIDDEN_DIM), jnp.bfloat16),
        compiler_params=pltpu.CompilerParams(
            dimension_semantics=("parallel",)),
    )(x_pad, w_gcn)


# ---------------------------------------------------------------------------
# Stage 2: tiled A_hat @ XW with fused bias/ReLU/MLP head/log_softmax finalize.
# ---------------------------------------------------------------------------
def _agg_head_kernel(adj_ref, xw_ref, b_gcn_ref,
                     w1_ref, b1_ref, w2_ref, b2_ref, w3_ref, b3_ref,
                     out_ref, acc_ref):
    k = pl.program_id(1)

    @pl.when(k == 0)
    def _():
        acc_ref[...] = jnp.zeros_like(acc_ref)

    # O(N^2) term: bf16 adjacency tile x bf16 XW tile -> f32 accumulator (MXU).
    acc_ref[...] += jnp.dot(adj_ref[...], xw_ref[...],
                            preferred_element_type=jnp.float32)

    @pl.when(k == pl.num_programs(1) - 1)
    def _():
        # GCNConv bias + ReLU (F.dropout is identity in inference mode).
        h = jnp.maximum(acc_ref[...] + b_gcn_ref[...], 0.0)

        # post_mp MLP head; 64x64 / padded 64x64 weights stay VMEM-resident
        # via constant index_maps, hidden under the next adj-tile DMA.
        a = jnp.maximum(
            jnp.dot(h, w1_ref[...], preferred_element_type=jnp.float32)
            + b1_ref[...], 0.0)
        b = jnp.maximum(
            jnp.dot(a, w2_ref[...], preferred_element_type=jnp.float32)
            + b2_ref[...], 0.0)
        # w3/b3 are zero/NEG_BIG padded to 64 columns -> logits stay lane-wide;
        # padded columns contribute exp(~-1e30)=0 to the softmax sum.
        logits = jnp.dot(b, w3_ref[...], preferred_element_type=jnp.float32) \
            + b3_ref[...]
        m = jnp.max(logits, axis=1, keepdims=True)
        lse = m + jnp.log(jnp.sum(jnp.exp(logits - m), axis=1, keepdims=True))
        logp = logits - lse

        # Single lane-dense (tm, 128) store: [h(64) | logp(64)].
        out_ref[...] = jnp.concatenate([h, logp], axis=-1)


def gnn_stack_forward(x, edge_index, params, *, tm=256, tk=512):
    """x: [N, 22] f32; edge_index: [2, E] int32 -> (x_out [N,64], log_probs [N,2])."""
    n = x.shape[0]

    # Tile sizes: tm = row tile (multiple of 16), tk = source/K tile
    # (multiple of 128).  Shrunk for small graphs; defaults chosen to fit
    # comfortably in v7x's 64 MiB VMEM with double buffering.
    tm = min(tm, _round_up(n, 16))
    tk = min(tk, _round_up(n, 128))
    m_pad = _round_up(n, tm)
    k_pad = _round_up(n, tk)

    # ---- plain-JAX glue: normalized dense adjacency (PyG gcn_norm) ----
    # add_remaining_self_loops: existing self-loops are dropped (weight 0),
    # exactly one self-loop per node is added with weight 1.
    row, col = edge_index[0], edge_index[1]
    keep = (row != col).astype(jnp.float32)
    loops = jnp.arange(n, dtype=edge_index.dtype)
    rows = jnp.concatenate([row, loops])
    cols = jnp.concatenate([col, loops])
    w_e = jnp.concatenate([keep, jnp.ones((n,), jnp.float32)])
    deg = jnp.zeros((n,), jnp.float32).at[cols].add(w_e)
    dinv = jnp.where(deg > 0, jax.lax.rsqrt(deg), 0.0)
    norm = dinv[rows] * dinv[cols] * w_e
    # message from source j (rows) aggregated at target i (cols):
    # adj[target, source] += norm   (duplicate edges accumulate, as scatter-add)
    adj = jnp.zeros((m_pad, k_pad), jnp.float32).at[cols, rows].add(norm)
    adj = adj.astype(jnp.bfloat16)  # halve HBM traffic of the O(N^2) term

    x_pad = jnp.zeros((k_pad, INPUT_DIM), jnp.float32).at[:n].set(x)

    # Stage 1: hoisted XW (streamed per K tile in stage 2).
    xw = _compute_xw(x_pad, params["w_gcn"], tk)

    # Pad head output weights so logits are 64 lanes wide (no 2-wide stores);
    # padded logit columns get a huge negative bias so they vanish in softmax.
    w3_pad = jnp.zeros((HIDDEN_DIM, HIDDEN_DIM), jnp.float32)
    w3_pad = w3_pad.at[:, :OUT_DIM].set(params["w3"])
    b3_pad = jnp.full((1, HIDDEN_DIM), NEG_BIG, jnp.float32)
    b3_pad = b3_pad.at[:, :OUT_DIM].set(params["b3"])

    grid = (m_pad // tm, k_pad // tk)

    # Explicit VMEM budget from the chosen tiles (double-buffered I/O).
    vmem_bytes = (2 * tm * tk * 2              # adj tiles (bf16)
                  + 2 * tk * HIDDEN_DIM * 2    # xw tiles (bf16)
                  + 2 * tm * OUT_SLAB * 4      # output slab tiles (f32)
                  + tm * HIDDEN_DIM * 4        # accumulator scratch
                  + 128 * 1024)                # resident head weights + slack
    vmem_limit = int(min(max(4 * vmem_bytes, 8 << 20), 32 << 20))

    const = lambda shape: pl.BlockSpec(shape, lambda i, k: (0, 0))
    in_specs = [
        pl.BlockSpec((tm, tk), lambda i, k: (i, k)),           # adjacency tile
        pl.BlockSpec((tk, HIDDEN_DIM), lambda i, k: (k, 0)),   # XW tile
        const(params["b_gcn"].shape),
        const(params["w1"].shape), const(params["b1"].shape),
        const(params["w2"].shape), const(params["b2"].shape),
        const(w3_pad.shape), const(b3_pad.shape),
    ]

    out_slab = pl.pallas_call(
        _agg_head_kernel,
        grid=grid,
        in_specs=in_specs,
        out_specs=pl.BlockSpec((tm, OUT_SLAB), lambda i, k: (i, 0)),
        out_shape=jax.ShapeDtypeStruct((m_pad, OUT_SLAB), jnp.float32),
        scratch_shapes=[pltpu.VMEM((tm, HIDDEN_DIM), jnp.float32)],
        compiler_params=pltpu.CompilerParams(
            dimension_semantics=("parallel", "arbitrary"),
            vmem_limit_bytes=vmem_limit,
        ),
    )(adj, xw, params["b_gcn"], params["w1"], params["b1"],
      params["w2"], params["b2"], w3_pad, b3_pad)

    x_out = out_slab[:n, :HIDDEN_DIM]
    log_probs = out_slab[:n, HIDDEN_DIM:HIDDEN_DIM + OUT_DIM]
    return x_out, log_probs


def init_params(key):
    ks = jax.random.split(key, 8)

    def lin(k, fan_in, fan_out):
        scale = 1.0 / jnp.sqrt(jnp.float32(fan_in))
        return jax.random.uniform(k, (fan_in, fan_out), jnp.float32, -scale, scale)

    return {
        "w_gcn": lin(ks[0], INPUT_DIM, HIDDEN_DIM),
        "b_gcn": jax.random.uniform(ks[1], (1, HIDDEN_DIM), jnp.float32, -0.1, 0.1),
        "w1": lin(ks[2], HIDDEN_DIM, HIDDEN_DIM),
        "b1": jax.random.uniform(ks[3], (1, HIDDEN_DIM), jnp.float32, -0.1, 0.1),
        "w2": lin(ks[4], HIDDEN_DIM, HIDDEN_DIM),
        "b2": jax.random.uniform(ks[5], (1, HIDDEN_DIM), jnp.float32, -0.1, 0.1),
        "w3": lin(ks[6], HIDDEN_DIM, OUT_DIM),
        "b3": jax.random.uniform(ks[7], (1, OUT_DIM), jnp.float32, -0.1, 0.1),
    }


def _reference(x, edge_index, params):
    """Plain-JAX f32 reference of the same forward pass (for validation)."""
    n = x.shape[0]
    row, col = edge_index[0], edge_index[1]
    keep = (row != col).astype(jnp.float32)
    loops = jnp.arange(n, dtype=edge_index.dtype)
    rows = jnp.concatenate([row, loops])
    cols = jnp.concatenate([col, loops])
    w_e = jnp.concatenate([keep, jnp.ones((n,), jnp.float32)])
    deg = jnp.zeros((n,), jnp.float32).at[cols].add(w_e)
    dinv = jnp.where(deg > 0, jax.lax.rsqrt(deg), 0.0)
    norm = dinv[rows] * dinv[cols] * w_e
    adj = jnp.zeros((n, n), jnp.float32).at[cols, rows].add(norm)
    h = jnp.maximum(adj @ (x @ params["w_gcn"]) + params["b_gcn"], 0.0)
    a = jnp.maximum(h @ params["w1"] + params["b1"], 0.0)
    b = jnp.maximum(a @ params["w2"] + params["b2"], 0.0)
    out = b @ params["w3"] + params["b3"]
    return h, jax.nn.log_softmax(out, axis=1)


if __name__ == "__main__":
    key = jax.random.PRNGKey(0)
    k_x, k_e, k_p = jax.random.split(key, 3)

    N, E = 16, 32  # small graph: 16 nodes, 32 edges
    x = jax.random.normal(k_x, (N, INPUT_DIM), jnp.float32)
    edge_index = jax.random.randint(k_e, (2, E), 0, N, jnp.int32)
    params = init_params(k_p)

    fwd = jax.jit(functools.partial(gnn_stack_forward))
    x_out, log_probs = fwd(x, edge_index, params)
    jax.block_until_ready((x_out, log_probs))

    assert x_out.shape == (N, HIDDEN_DIM)
    assert log_probs.shape == (N, OUT_DIM)
    # log_softmax sanity: rows sum to ~1 in prob space
    assert bool(jnp.allclose(jnp.sum(jnp.exp(log_probs), axis=1), 1.0, atol=1e-5))
    # match the plain-JAX f32 reference (loose tol: adjacency/XW are bf16)
    h_ref, lp_ref = _reference(x, edge_index, params)
    assert bool(jnp.allclose(x_out, h_ref, atol=5e-2, rtol=5e-2))
    assert bool(jnp.allclose(log_probs, lp_ref, atol=5e-2, rtol=5e-2))
    print("KERNEL_OK")
</pallas_src>

<mosaic_0001>
module attributes {stable_mosaic.version = 11 : i64} {
  func.func private @main(%arg0: i32) attributes {dimension_semantics = [#tpu.dimension_semantics<core_parallel>], iteration_bounds = array<i64: 2>, tpu.core_type = #tpu.core_type<sc_scalar_subcore>, window_params = []} {
    return
  }
}

module attributes {stable_mosaic.version = 11 : i64} {
  func.func private @main(%arg0: i32) attributes {dimension_semantics = [#tpu.dimension_semantics<core_parallel>], iteration_bounds = array<i64: 2>, tpu.core_type = #tpu.core_type<sc_scalar_subcore>, window_params = []} {
    return
  }
}

module attributes {stable_mosaic.version = 11 : i64} {
  func.func @_xw_kernel(%arg0: i32, %arg1: memref<128x22xf32, #tpu.memory_space<vmem>>, %arg2: memref<22x64xf32, #tpu.memory_space<vmem>>, %arg3: memref<128x64xbf16, #tpu.memory_space<vmem>>) attributes {dimension_semantics = [#tpu.dimension_semantics<parallel>], iteration_bounds = array<i64: 1>, scalar_prefetch = 0 : i64, scratch_operands = 0 : i64, tpu.core_type = #tpu.core_type<tc>, window_params = [{transform_indices = @transform_0, window_bounds = array<i64: 128, 22>}, {pipeline_mode = #tpu.pipeline_mode<synchronous>, transform_indices = @transform_1, window_bounds = array<i64: 22, 64>}, {transform_indices = @transform_2, window_bounds = array<i64: 128, 64>}]} {
    %c0 = arith.constant 0 : index
    %c0_0 = arith.constant 0 : index
    %0 = vector.load %arg1[%c0, %c0_0] : memref<128x22xf32, #tpu.memory_space<vmem>>, vector<128x22xf32>
    %c0_1 = arith.constant 0 : index
    %c0_2 = arith.constant 0 : index
    %1 = vector.load %arg2[%c0_1, %c0_2] : memref<22x64xf32, #tpu.memory_space<vmem>>, vector<22x64xf32>
    %cst = arith.constant dense<0.000000e+00> : vector<128x64xf32>
    %2 = tpu.matmul %0, %1, %cst {dimension_numbers = #tpu.dot_dimension_numbers<[1], [0], [0], [1], [0, 0, 1, 1], [], []>} : vector<128x22xf32>, vector<22x64xf32>, vector<128x64xf32> -> vector<128x64xf32>
    %3 = arith.truncf %2 : vector<128x64xf32> to vector<128x64xbf16>
    %c0_3 = arith.constant 0 : index
    %c0_4 = arith.constant 0 : index
    %4 = vector.load %arg3[%c0_3, %c0_4] : memref<128x64xbf16, #tpu.memory_space<vmem>>, vector<128x64xbf16>
    tpu.vector_store %arg3[%c0_3, %c0_4], %3 {strides = array<i32>} : memref<128x64xbf16, #tpu.memory_space<vmem>>, vector<128x64xbf16>,
    return
  }
  func.func @transform_0(%arg0: i32) -> (i32, i32) {
    %c0_i32 = arith.constant 0 : i32
    %c0_i32_0 = arith.constant 0 : i32
    return %arg0, %c0_i32 : i32, i32
  }
  func.func @transform_1(%arg0: i32) -> (i32, i32) {
    %c0_i32 = arith.constant 0 : i32
    %c0_i32_0 = arith.constant 0 : i32
    %c0_i32_1 = arith.constant 0 : i32
    return %c0_i32, %c0_i32_0 : i32, i32
  }
  func.func @transform_2(%arg0: i32) -> (i32, i32) {
    %c0_i32 = arith.constant 0 : i32
    %c0_i32_0 = arith.constant 0 : i32
    return %arg0, %c0_i32 : i32, i32
  }
}

module attributes {stable_mosaic.version = 11 : i64} {
  func.func @_agg_head_kernel(%arg0: i32, %arg1: i32, %arg2: memref<16x128xbf16, #tpu.memory_space<vmem>>, %arg3: memref<128x64xbf16, #tpu.memory_space<vmem>>, %arg4: memref<1x64xf32, #tpu.memory_space<vmem>>, %arg5: memref<64x64xf32, #tpu.memory_space<vmem>>, %arg6: memref<1x64xf32, #tpu.memory_space<vmem>>, %arg7: memref<64x64xf32, #tpu.memory_space<vmem>>, %arg8: memref<1x64xf32, #tpu.memory_space<vmem>>, %arg9: memref<64x64xf32, #tpu.memory_space<vmem>>, %arg10: memref<1x64xf32, #tpu.memory_space<vmem>>, %arg11: memref<16x128xf32, #tpu.memory_space<vmem>>, %arg12: memref<16x64xf32, #tpu.memory_space<vmem>>) attributes {dimension_semantics = [#tpu.dimension_semantics<parallel>, #tpu.dimension_semantics<arbitrary>], iteration_bounds = array<i64: 1, 1>, scalar_prefetch = 0 : i64, scratch_operands = 1 : i64, tpu.core_type = #tpu.core_type<tc>, window_params = [{transform_indices = @transform_0, window_bounds = array<i64: 16, 128>}, {transform_indices = @transform_1, window_bounds = array<i64: 128, 64>}, {pipeline_mode = #tpu.pipeline_mode<synchronous>, transform_indices = @transform_2, window_bounds = array<i64: 1, 64>}, {pipeline_mode = #tpu.pipeline_mode<synchronous>, transform_indices = @transform_3, window_bounds = array<i64: 64, 64>}, {pipeline_mode = #tpu.pipeline_mode<synchronous>, transform_indices = @transform_4, window_bounds = array<i64: 1, 64>}, {pipeline_mode = #tpu.pipeline_mode<synchronous>, transform_indices = @transform_5, window_bounds = array<i64: 64, 64>}, {pipeline_mode = #tpu.pipeline_mode<synchronous>, transform_indices = @transform_6, window_bounds = array<i64: 1, 64>}, {pipeline_mode = #tpu.pipeline_mode<synchronous>, transform_indices = @transform_7, window_bounds = array<i64: 64, 64>}, {pipeline_mode = #tpu.pipeline_mode<synchronous>, transform_indices = @transform_8, window_bounds = array<i64: 1, 64>}, {transform_indices = @transform_9, window_bounds = array<i64: 16, 128>}]} {
    %c0_i32 = arith.constant 0 : i32
    %0 = arith.cmpi eq, %arg1, %c0_i32 : i32
    %1 = arith.extui %0 : i1 to i32
    %c0_i32_0 = arith.constant 0 : i32
    %2 = arith.cmpi ne, %1, %c0_i32_0 : i32
    scf.if %2 {
      %cst_10 = arith.constant 0.000000e+00 : f32
      %12 = vector.broadcast %cst_10 : f32 to vector<16x64xf32>
      %c0_11 = arith.constant 0 : index
      %c0_12 = arith.constant 0 : index
      %13 = vector.load %arg12[%c0_11, %c0_12] : memref<16x64xf32, #tpu.memory_space<vmem>>, vector<16x64xf32>
      tpu.vector_store %arg12[%c0_11, %c0_12], %12 {strides = array<i32>} : memref<16x64xf32, #tpu.memory_space<vmem>>, vector<16x64xf32>,
    } else {
    }
    %c0 = arith.constant 0 : index
    %c0_1 = arith.constant 0 : index
    %3 = vector.load %arg12[%c0, %c0_1] : memref<16x64xf32, #tpu.memory_space<vmem>>, vector<16x64xf32>
    %c0_2 = arith.constant 0 : index
    %c0_3 = arith.constant 0 : index
    %4 = vector.load %arg2[%c0_2, %c0_3] : memref<16x128xbf16, #tpu.memory_space<vmem>>, vector<16x128xbf16>
    %c0_4 = arith.constant 0 : index
    %c0_5 = arith.constant 0 : index
    %5 = vector.load %arg3[%c0_4, %c0_5] : memref<128x64xbf16, #tpu.memory_space<vmem>>, vector<128x64xbf16>
    %cst = arith.constant dense<0.000000e+00> : vector<16x64xf32>
    %6 = tpu.matmul %4, %5, %cst {dimension_numbers = #tpu.dot_dimension_numbers<[1], [0], [0], [1], [0, 0, 1, 1], [], []>} : vector<16x128xbf16>, vector<128x64xbf16>, vector<16x64xf32> -> vector<16x64xf32>
    %7 = arith.addf %3, %6 : vector<16x64xf32>
    %c0_6 = arith.constant 0 : index
    %c0_7 = arith.constant 0 : index
    %8 = vector.load %arg12[%c0_6, %c0_7] : memref<16x64xf32, #tpu.memory_space<vmem>>, vector<16x64xf32>
    tpu.vector_store %arg12[%c0_6, %c0_7], %7 {strides = array<i32>} : memref<16x64xf32, #tpu.memory_space<vmem>>, vector<16x64xf32>,
    %c0_i32_8 = arith.constant 0 : i32
    %9 = arith.cmpi eq, %arg1, %c0_i32_8 : i32
    %10 = arith.extui %9 : i1 to i32
    %c0_i32_9 = arith.constant 0 : i32
    %11 = arith.cmpi ne, %10, %c0_i32_9 : i32
    scf.if %11 {
      %c0_10 = arith.constant 0 : index
      %c0_11 = arith.constant 0 : index
      %12 = vector.load %arg12[%c0_10, %c0_11] : memref<16x64xf32, #tpu.memory_space<vmem>>, vector<16x64xf32>
      %c0_12 = arith.constant 0 : index
      %c0_13 = arith.constant 0 : index
      %13 = vector.load %arg4[%c0_12, %c0_13] : memref<1x64xf32, #tpu.memory_space<vmem>>, vector<1x64xf32>
      %14 = vector.broadcast %13 : vector<1x64xf32> to vector<16x64xf32>
      %15 = arith.addf %12, %14 : vector<16x64xf32>
      %cst_14 = arith.constant 0.000000e+00 : f32
      %16 = vector.broadcast %cst_14 : f32 to vector<16x64xf32>
      %17 = arith.maximumf %15, %16 : vector<16x64xf32>
      %c0_15 = arith.constant 0 : index
      %c0_16 = arith.constant 0 : index
      %18 = vector.load %arg5[%c0_15, %c0_16] : memref<64x64xf32, #tpu.memory_space<vmem>>, vector<64x64xf32>
      %cst_17 = arith.constant dense<0.000000e+00> : vector<16x64xf32>
      %19 = tpu.matmul %17, %18, %cst_17 {dimension_numbers = #tpu.dot_dimension_numbers<[1], [0], [0], [1], [0, 0, 1, 1], [], []>} : vector<16x64xf32>, vector<64x64xf32>, vector<16x64xf32> -> vector<16x64xf32>
      %c0_18 = arith.constant 0 : index
      %c0_19 = arith.constant 0 : index
      %20 = vector.load %arg6[%c0_18, %c0_19] : memref<1x64xf32, #tpu.memory_space<vmem>>, vector<1x64xf32>
      %21 = vector.broadcast %20 : vector<1x64xf32> to vector<16x64xf32>
      %22 = arith.addf %19, %21 : vector<16x64xf32>
      %cst_20 = arith.constant 0.000000e+00 : f32
      %23 = vector.broadcast %cst_20 : f32 to vector<16x64xf32>
      %24 = arith.maximumf %22, %23 : vector<16x64xf32>
      %c0_21 = arith.constant 0 : index
      %c0_22 = arith.constant 0 : index
      %25 = vector.load %arg7[%c0_21, %c0_22] : memref<64x64xf32, #tpu.memory_space<vmem>>, vector<64x64xf32>
      %cst_23 = arith.constant dense<0.000000e+00> : vector<16x64xf32>
      %26 = tpu.matmul %24, %25, %cst_23 {dimension_numbers = #tpu.dot_dimension_numbers<[1], [0], [0], [1], [0, 0, 1, 1], [], []>} : vector<16x64xf32>, vector<64x64xf32>, vector<16x64xf32> -> vector<16x64xf32>
      %c0_24 = arith.constant 0 : index
      %c0_25 = arith.constant 0 : index
      %27 = vector.load %arg8[%c0_24, %c0_25] : memref<1x64xf32, #tpu.memory_space<vmem>>, vector<1x64xf32>
      %28 = vector.broadcast %27 : vector<1x64xf32> to vector<16x64xf32>
      %29 = arith.addf %26, %28 : vector<16x64xf32>
      %cst_26 = arith.constant 0.000000e+00 : f32
      %30 = vector.broadcast %cst_26 : f32 to vector<16x64xf32>
      %31 = arith.maximumf %29, %30 : vector<16x64xf32>
      %c0_27 = arith.constant 0 : index
      %c0_28 = arith.constant 0 : index
      %32 = vector.load %arg9[%c0_27, %c0_28] : memref<64x64xf32, #tpu.memory_space<vmem>>, vector<64x64xf32>
      %cst_29 = arith.constant dense<0.000000e+00> : vector<16x64xf32>
      %33 = tpu.matmul %31, %32, %cst_29 {dimension_numbers = #tpu.dot_dimension_numbers<[1], [0], [0], [1], [0, 0, 1, 1], [], []>} : vector<16x64xf32>, vector<64x64xf32>, vector<16x64xf32> -> vector<16x64xf32>
      %c0_30 = arith.constant 0 : index
      %c0_31 = arith.constant 0 : index
      %34 = vector.load %arg10[%c0_30, %c0_31] : memref<1x64xf32, #tpu.memory_space<vmem>>, vector<1x64xf32>
      %35 = vector.broadcast %34 : vector<1x64xf32> to vector<16x64xf32>
      %36 = arith.addf %33, %35 : vector<16x64xf32>
      %cst_32 = arith.constant dense<0xFF800000> : vector<16xf32>
      %37 = vector.multi_reduction <maximumf>, %36, %cst_32 [1] : vector<16x64xf32> to vector<16xf32>
      %38 = vector.shape_cast %37 : vector<16xf32> to vector<16x1xf32>
      %39 = vector.broadcast %38 : vector<16x1xf32> to vector<16x64xf32>
      %40 = arith.subf %36, %39 : vector<16x64xf32>
      %41 = math.exp %40 : vector<16x64xf32>
      %cst_33 = arith.constant dense<0.000000e+00> : vector<16xf32>
      %42 = vector.multi_reduction <add>, %41, %cst_33 [1] : vector<16x64xf32> to vector<16xf32>
      %43 = vector.shape_cast %42 : vector<16xf32> to vector<16x1xf32>
      %44 = math.log %43 : vector<16x1xf32>
      %45 = arith.addf %38, %44 : vector<16x1xf32>
      %46 = vector.broadcast %45 : vector<16x1xf32> to vector<16x64xf32>
      %47 = arith.subf %36, %46 : vector<16x64xf32>
      %48 = tpu.concatenate %17, %47 in 1 : vector<16x64xf32>, vector<16x64xf32> -> vector<16x128xf32>
      %c0_34 = arith.constant 0 : index
      %c0_35 = arith.constant 0 : index
      %49 = vector.load %arg11[%c0_34, %c0_35] : memref<16x128xf32, #tpu.memory_space<vmem>>, vector<16x128xf32>
      tpu.vector_store %arg11[%c0_34, %c0_35], %48 {strides = array<i32>} : memref<16x128xf32, #tpu.memory_space<vmem>>, vector<16x128xf32>,
    } else {
    }
    return
  }
  func.func @transform_0(%arg0: i32, %arg1: i32) -> (i32, i32) {
    %c0_i32 = arith.constant 0 : i32
    return %arg0, %arg1 : i32, i32
  }
  func.func @transform_1(%arg0: i32, %arg1: i32) -> (i32, i32) {
    %c0_i32 = arith.constant 0 : i32
    %c0_i32_0 = arith.constant 0 : i32
    return %arg1, %c0_i32 : i32, i32
  }
  func.func @transform_2(%arg0: i32, %arg1: i32) -> (i32, i32) {
    %c0_i32 = arith.constant 0 : i32
    %c0_i32_0 = arith.constant 0 : i32
    %c0_i32_1 = arith.constant 0 : i32
    return %c0_i32, %c0_i32_0 : i32, i32
  }
  func.func @transform_3(%arg0: i32, %arg1: i32) -> (i32, i32) {
    %c0_i32 = arith.constant 0 : i32
    %c0_i32_0 = arith.constant 0 : i32
    %c0_i32_1 = arith.constant 0 : i32
    return %c0_i32, %c0_i32_0 : i32, i32
  }
  func.func @transform_4(%arg0: i32, %arg1: i32) -> (i32, i32) {
    %c0_i32 = arith.constant 0 : i32
    %c0_i32_0 = arith.constant 0 : i32
    %c0_i32_1 = arith.constant 0 : i32
    return %c0_i32, %c0_i32_0 : i32, i32
  }
  func.func @transform_5(%arg0: i32, %arg1: i32) -> (i32, i32) {
    %c0_i32 = arith.constant 0 : i32
    %c0_i32_0 = arith.constant 0 : i32
    %c0_i32_1 = arith.constant 0 : i32
    return %c0_i32, %c0_i32_0 : i32, i32
  }
  func.func @transform_6(%arg0: i32, %arg1: i32) -> (i32, i32) {
    %c0_i32 = arith.constant 0 : i32
    %c0_i32_0 = arith.constant 0 : i32
    %c0_i32_1 = arith.constant 0 : i32
    return %c0_i32, %c0_i32_0 : i32, i32
  }
  func.func @transform_7(%arg0: i32, %arg1: i32) -> (i32, i32) {
    %c0_i32 = arith.constant 0 : i32
    %c0_i32_0 = arith.constant 0 : i32
    %c0_i32_1 = arith.constant 0 : i32
    return %c0_i32, %c0_i32_0 : i32, i32
  }
  func.func @transform_8(%arg0: i32, %arg1: i32) -> (i32, i32) {
    %c0_i32 = arith.constant 0 : i32
    %c0_i32_0 = arith.constant 0 : i32
    %c0_i32_1 = arith.constant 0 : i32
    return %c0_i32, %c0_i32_0 : i32, i32
  }
  func.func @transform_9(%arg0: i32, %arg1: i32) -> (i32, i32) {
    %c0_i32 = arith.constant 0 : i32
    %c0_i32_0 = arith.constant 0 : i32
    return %arg0, %c0_i32 : i32, i32
  }
}

</mosaic_0001>

<bundles_post_ra>
// kernel: gnn_stack_forward.2
= control target key start
LH: loop header
LB: loop body
LE: loop exit
PB: predicated region body
PF: predicated region fallthrough
CT: control target
= control target key end

     0   :  { %vm79_vm0 = vcmask 1045504   ;;  %vm30_vm1 = vcmask 179200   ;;  %vm292_vm2 = vcmask 519168   ;;  %s569_s1 = inlined_call_operand.vmem [shape: f32[22,64], index: 1, kind: input, shape index: {}]   ;;  %s570_s0 = inlined_call_operand.vmem [shape: f32[128,22], index: 0, kind: input, shape index: {}]   ;;  %s571_s2 = inlined_call_operand.vmem [shape: bf16[128,64], index: 2, kind: output, shape index: {}]  }
   0x1   :  { %v29_v0 = vld [vmem:[%s569_s1 + $0x10] sm:$0x3f]  ;;  %v28_v1 = vld [vmem:[%s569_s1 + $0x8] sm:$0xff]  ;;  %v27_v2 = vld [vmem:[%s569_s1] sm:$0xff] }
   0x2   :  { %381 = vmatprep.subr.msk.mxu0 %vm79_vm0, %v29_v0  ;;  %411 = vmatprep.subr.msk.mxu1 %vm79_vm0, %v29_v0  ;;  %v11_v3 = vld [vmem:[%s570_s0] sm:$0xff]  ;;  %v12_v5 = vld [vmem:[%s570_s0 + $0x8] sm:$0xff]  ;;  %v13_v7 = vld [vmem:[%s570_s0 + $0x10] sm:$0xff] }
   0x3   :  { %382 = vmatpush3.msk.msra.mxu0 %vm79_vm0, %v29_v0  ;;  %414 = vmatpush3.msk.msra.mxu1 %vm79_vm0, %v29_v0  ;;  %v19_v4 = vld [vmem:[%s570_s0 + $0x40] sm:$0xff]  ;;  %v20_v6 = vld [vmem:[%s570_s0 + $0x48] sm:$0xff]  ;;  %v21_v8 = vld [vmem:[%s570_s0 + $0x50] sm:$0xff] }
   0x4   :  { %383 = vmatprep.subr.mxu0 %v28_v1  ;;  %412 = vmatprep.subr.mxu1 %v28_v1  ;;  %v14_v9 = vld [vmem:[%s570_s0 + $0x18] sm:$0xff]  ;;  %v15_v11 = vld [vmem:[%s570_s0 + $0x20] sm:$0xff]  ;;  %v16_v13 = vld [vmem:[%s570_s0 + $0x28] sm:$0xff] }
   0x5   :  { %384 = vmatpush3.msra.mxu0 %v28_v1  ;;  %415 = vmatpush3.msra.mxu1 %v28_v1  ;;  %v22_v10 = vld [vmem:[%s570_s0 + $0x58] sm:$0xff]  ;;  %v23_v12 = vld [vmem:[%s570_s0 + $0x60] sm:$0xff]  ;;  %v24_v14 = vld [vmem:[%s570_s0 + $0x68] sm:$0xff] }
   0x6   :  { %385 = vmatprep.subr.mxu0 %v27_v2  ;;  %413 = vmatprep.subr.mxu1 %v27_v2  ;;  %v17_v15 = vld [vmem:[%s570_s0 + $0x30] sm:$0xff]  ;;  %v18_v17 = vld [vmem:[%s570_s0 + $0x38] sm:$0xff] }
   0x7   :  { %386 = vmatpush3.msra.mxu0 %v27_v2  ;;  %416 = vmatpush3.msra.mxu1 %v27_v2  ;;  %v25_v16 = vld [vmem:[%s570_s0 + $0x70] sm:$0xff]  ;;  %v26_v18 = vld [vmem:[%s570_s0 + $0x78] sm:$0xff] }
   0x8   :  { %387 = vmatprep.mubr.msk.f32.mxu0 %vm30_vm1, %v11_v3  ;;  %399 = vmatprep.mubr.msk.f32.mxu1 %vm30_vm1, %v19_v4 }
   0x9   :  { %388 = vmatmul.mubr.msk.f32.vlgmr.msra.gmra.mxu0 %vm30_vm1, %v12_v5  ;;  %400 = vmatmul.mubr.msk.f32.vlgmr.msra.gmra.mxu1 %vm30_vm1, %v20_v6 }
   0xa   :  { %390 = vmatprep.mubr.msk.f32.mxu0 %vm30_vm1, %v13_v7  ;;  %402 = vmatprep.mubr.msk.f32.mxu1 %vm30_vm1, %v21_v8 }
   0xd   :  { %391 = vmatmul.mubr.msk.f32.gmra.mxu0 %vm30_vm1, %v14_v9  ;;  %403 = vmatmul.mubr.msk.f32.gmra.mxu1 %vm30_vm1, %v22_v10 }
   0xe   :  { %393 = vmatprep.mubr.msk.f32.mxu0 %vm30_vm1, %v15_v11  ;;  %405 = vmatprep.mubr.msk.f32.mxu1 %vm30_vm1, %v23_v12 }
  0x11   :  { %394 = vmatmul.mubr.msk.f32.gmra.mxu0 %vm30_vm1, %v16_v13  ;;  %406 = vmatmul.mubr.msk.f32.gmra.mxu1 %vm30_vm1, %v24_v14 }
  0x12   :  { %396 = vmatprep.mubr.msk.f32.mxu0 %vm30_vm1, %v17_v15  ;;  %408 = vmatprep.mubr.msk.f32.mxu1 %vm30_vm1, %v25_v16 }
  0x15   :  { %397 = vmatmul.mubr.msk.f32.gmra.mxu0 %vm30_vm1, %v18_v17  ;;  %409 = vmatmul.mubr.msk.f32.gmra.mxu1 %vm30_vm1, %v26_v18 }
  0xc9   :  { %v389_v19 = vpop.f32.mrf.mxu0  ;;  %v401_v20 = vpop.f32.mrf.mxu1 }
  0xca   :  { %v347_v21 = vpack.c.bf16 %v389_v19, %v389_v19  ;;  %v355_v22 = vpack.c.bf16 %v401_v20, %v401_v20 }
  0xcb   :  { %v149_v23 = vpop.f32.mrf.mxu0  ;;  %v189_v24 = vpop.f32.mrf.mxu1 }
  0xcc   :  { %294 = vst.msk [vmem:[%s571_s2 + $0x4] sm:$0xf] %vm292_vm2, %v347_v21  ;;  %302 = vst.msk [vmem:[%s571_s2 + $0x24] sm:$0xf] %vm292_vm2, %v355_v22  ;;  %v346_v25 = vpack.c.bf16 %v149_v23, %v149_v23  ;;  %v354_v26 = vpack.c.bf16 %v189_v24, %v189_v24 }
  0xcd   :  { %v392_v27 = vpop.f32.mrf.mxu0  ;;  %v404_v28 = vpop.f32.mrf.mxu1 }
  0xce   :  { %293 = vst.msk [vmem:[%s571_s2] sm:$0xf] %vm292_vm2, %v346_v25  ;;  %301 = vst.msk [vmem:[%s571_s2 + $0x20] sm:$0xf] %vm292_vm2, %v354_v26  ;;  %v349_v29 = vpack.c.bf16 %v392_v27, %v392_v27  ;;  %v357_v30 = vpack.c.bf16 %v404_v28, %v404_v28 }
  0xcf   :  { %v159_v31 = vpop.f32.mrf.mxu0  ;;  %v199_v32 = vpop.f32.mrf.mxu1 }
  0xd0   :  { %296 = vst.msk [vmem:[%s571_s2 + $0xc] sm:$0xf] %vm292_vm2, %v349_v29  ;;  %304 = vst.msk [vmem:[%s571_s2 + $0x2c] sm:$0xf] %vm292_vm2, %v357_v30  ;;  %v348_v33 = vpack.c.bf16 %v159_v31, %v159_v31  ;;  %v356_v34 = vpack.c.bf16 %v199_v32, %v199_v32 }
  0xd1   :  { %v395_v35 = vpop.f32.mrf.mxu0  ;;  %v407_v36 = vpop.f32.mrf.mxu1 }
  0xd2   :  { %295 = vst.msk [vmem:[%s571_s2 + $0x8] sm:$0xf] %vm292_vm2, %v348_v33  ;;  %303 = vst.msk [vmem:[%s571_s2 + $0x28] sm:$0xf] %vm292_vm2, %v356_v34  ;;  %v351_v37 = vpack.c.bf16 %v395_v35, %v395_v35  ;;  %v359_v38 = vpack.c.bf16 %v407_v36, %v407_v36 }
  0xd3   :  { %v169_v39 = vpop.f32.mrf.mxu0  ;;  %v209_v40 = vpop.f32.mrf.mxu1 }
  0xd4   :  { %298 = vst.msk [vmem:[%s571_s2 + $0x14] sm:$0xf] %vm292_vm2, %v351_v37  ;;  %306 = vst.msk [vmem:[%s571_s2 + $0x34] sm:$0xf] %vm292_vm2, %v359_v38  ;;  %v350_v41 = vpack.c.bf16 %v169_v39, %v169_v39  ;;  %v358_v42 = vpack.c.bf16 %v209_v40, %v209_v40 }
  0xd5   :  { %v398_v43 = vpop.f32.mrf.mxu0  ;;  %v410_v44 = vpop.f32.mrf.mxu1 }
  0xd6   :  { %297 = vst.msk [vmem:[%s571_s2 + $0x10] sm:$0xf] %vm292_vm2, %v350_v41  ;;  %305 = vst.msk [vmem:[%s571_s2 + $0x30] sm:$0xf] %vm292_vm2, %v358_v42  ;;  %v353_v45 = vpack.c.bf16 %v398_v43, %v398_v43  ;;  %v361_v46 = vpack.c.bf16 %v410_v44, %v410_v44 }
  0xd7   :  { %v179_v47 = vpop.f32.mrf.mxu0  ;;  %v219_v48 = vpop.f32.mrf.mxu1 }
  0xd8   :  { %300 = vst.msk [vmem:[%s571_s2 + $0x1c] sm:$0xf] %vm292_vm2, %v353_v45  ;;  %308 = vst.msk [vmem:[%s571_s2 + $0x3c] sm:$0xf] %vm292_vm2, %v361_v46  ;;  %v352_v49 = vpack.c.bf16 %v179_v47, %v179_v47  ;;  %v360_v50 = vpack.c.bf16 %v219_v48, %v219_v48 }
  0xda   :  { %299 = vst.msk [vmem:[%s571_s2 + $0x18] sm:$0xf] %vm292_vm2, %v352_v49  ;;  %307 = vst.msk [vmem:[%s571_s2 + $0x38] sm:$0xf] %vm292_vm2, %v360_v50 }

// kernel: gnn_stack_forward.3
= control target key start
LH: loop header
LB: loop body
LE: loop exit
PB: predicated region body
PF: predicated region fallthrough
CT: control target
= control target key end

     0   :  { %vm37_vm0 = vcmask 523264   ;;  %v665_v0 = vmov 0.0   ;;  %vm666_vm1 = vmmov 0   ;;  %s865_s1 = inlined_call_operand.vmem [shape: bf16[128,64], index: 1, kind: input, shape index: {}]   ;;  %s866_s0 = inlined_call_operand.vmem [shape: bf16[16,128], index: 0, kind: input, shape index: {}]   ;;  %s867_s3 = inlined_call_operand.vmem [shape: f32[64,64], index: 3, kind: input, shape index: {}]   ;;  %s868_s5 = inlined_call_operand.vmem [shape: f32[64,64], index: 5, kind: input, shape index: {}]   ;;  %s869_s2 = inlined_call_operand.vmem [shape: f32[1,64], index: 2, kind: input, shape index: {}]   ;;  %s870_s7 = inlined_call_operand.vmem [shape: f32[64,64], index: 7, kind: input, shape index: {}]   ;;  %s871_s4 = inlined_call_operand.vmem [shape: f32[1,64], index: 4, kind: input, shape index: {}]   ;;  %s872_s6 = inlined_call_operand.vmem [shape: f32[1,64], index: 6, kind: input, shape index: {}]   ;;  %s873_s8 = inlined_call_operand.vmem [shape: f32[1,64], index: 8, kind: input, shape index: {}]   ;;  %s874_s9 = inlined_call_operand.vmem [shape: f32[16,128], index: 9, kind: output, shape index: {}]  }
   0x1   :  { %568 = vmatprep.subr.bf16.mxu0 %v665_v0  ;;  %v648_v1 = vld [vmem:[%s865_s1 + $0x38] sm:$0xff]   ;;  %584 = vmatprep.mubr.msk.bf16.mxu0 %vm666_vm1, %v665_v0  ;;  %38 = vst.msk [vmem:[#allocation2] sm:$0xff] %vm37_vm0, %v665_v0  ;;  %39 = vst.msk [vmem:[#allocation2 + $0x8] sm:$0xff] %vm37_vm0, %v665_v0  ;;  %v649_v2 = vld [vmem:[%s865_s1 + $0x30] sm:$0xff]  }
   0x2   :  { %569 = vmatpush3.bf16.msra.mxu0 %v648_v1  ;;  %v650_v3 = vld [vmem:[%s865_s1 + $0x28] sm:$0xff]   ;;  %v651_v4 = vld [vmem:[%s865_s1 + $0x20] sm:$0xff]   ;;  %v652_v5 = vld [vmem:[%s865_s1 + $0x18] sm:$0xff]  }
   0x3   :  { %570 = vmatprep.subr.bf16.mxu0 %v665_v0  ;;  %v653_v6 = vld [vmem:[%s865_s1 + $0x10] sm:$0xff]   ;;  %v654_v7 = vld [vmem:[%s865_s1 + $0x8] sm:$0xff]   ;;  %v655_v8 = vld [vmem:[%s865_s1] sm:$0xff]  }
   0x4   :  { %v656_v9 = vld [vmem:[%s866_s0] sm:$0xff]   ;;  %v183_v10 = vld [vmem:[%s867_s3 + $0x38] sm:$0xff]  ;;  %v182_v11 = vld [vmem:[%s867_s3 + $0x30] sm:$0xff] }
   0x5   :  { %588 = vmatprep.subr.mxu1 %v183_v10  ;;  %v181_v12 = vld [vmem:[%s867_s3 + $0x28] sm:$0xff]  ;;  %v180_v13 = vld [vmem:[%s867_s3 + $0x20] sm:$0xff]  ;;  %v179_v14 = vld [vmem:[%s867_s3 + $0x18] sm:$0xff] }
   0x6   :  { %571 = vmatpush3.bf16.msra.mxu0 %v649_v2  ;;  %589 = vmatpush3.msra.mxu1 %v183_v10  ;;  %v178_v15 = vld [vmem:[%s867_s3 + $0x10] sm:$0xff]  ;;  %v177_v16 = vld [vmem:[%s867_s3 + $0x8] sm:$0xff]  ;;  %v176_v17 = vld [vmem:[%s867_s3] sm:$0xff] }
   0x7   :  { %572 = vmatprep.subr.bf16.mxu0 %v665_v0  ;;  %590 = vmatprep.subr.mxu1 %v182_v11  ;;  %v281_v18 = vld [vmem:[%s868_s5 + $0x38] sm:$0xff]  ;;  %v519_v27 = vld [vmem:[%s869_s2] ss:$0 sm:$0xff]  ;;  %v280_v34 = vld [vmem:[%s868_s5 + $0x30] sm:$0xff] }
   0x8   :  { %591 = vmatpush3.msra.mxu1 %v182_v11  ;;  %v40_v19 = vld [vmem:[#allocation2] sm:$0xff]  ;;  %v41_v23 = vld [vmem:[#allocation2 + $0x8] sm:$0xff]  ;;  %v277_v37 = vld [vmem:[%s868_s5 + $0x18] sm:$0xff] }
   0x9   :  { %592 = vmatprep.subr.mxu1 %v181_v12  ;;  %v279_v35 = vld [vmem:[%s868_s5 + $0x28] sm:$0xff]  ;;  %v278_v36 = vld [vmem:[%s868_s5 + $0x20] sm:$0xff]  ;;  %v276_v38 = vld [vmem:[%s868_s5 + $0x10] sm:$0xff] }
   0xa   :  { %573 = vmatpush3.bf16.msra.mxu0 %v650_v3  ;;  %593 = vmatpush3.msra.mxu1 %v181_v12  ;;  %v275_v39 = vld [vmem:[%s868_s5 + $0x8] sm:$0xff]  ;;  %v274_v40 = vld [vmem:[%s868_s5] sm:$0xff]  ;;  %v379_v41 = vld [vmem:[%s870_s7 + $0x38] sm:$0xff] }
   0xb   :  { %574 = vmatprep.subr.bf16.mxu0 %v665_v0  ;;  %594 = vmatprep.subr.mxu1 %v180_v13  ;;  %v378_v42 = vld [vmem:[%s870_s7 + $0x30] sm:$0xff]  ;;  %v377_v43 = vld [vmem:[%s870_s7 + $0x28] sm:$0xff]  ;;  %v376_v44 = vld [vmem:[%s870_s7 + $0x20] sm:$0xff] }
   0xc   :  { %595 = vmatpush3.msra.mxu1 %v180_v13  ;;  %v520_v45 = vld [vmem:[%s871_s4] ss:$0 sm:$0xff]  ;;  %v375_v52 = vld [vmem:[%s870_s7 + $0x18] sm:$0xff]  ;;  %v374_v53 = vld [vmem:[%s870_s7 + $0x10] sm:$0xff] }
   0xd   :  { %596 = vmatprep.subr.mxu1 %v179_v14  ;;  %v373_v54 = vld [vmem:[%s870_s7 + $0x8] sm:$0xff]  ;;  %v372_v55 = vld [vmem:[%s870_s7] sm:$0xff] }
   0xe   :  { %575 = vmatpush3.bf16.msra.mxu0 %v651_v4  ;;  %597 = vmatpush3.msra.mxu1 %v179_v14  ;;  %v523_v56 = vld [vmem:[%s872_s6] ss:$0 sm:$0xff]  ;;  %s667_s6 = smov 64  }
   0xf   :  { %576 = vmatprep.subr.bf16.mxu0 %v665_v0  ;;  %598 = vmatprep.subr.mxu1 %v178_v15 }
  0x10   :  { %599 = vmatpush3.msra.mxu1 %v178_v15 }
  0x11   :  { %600 = vmatprep.subr.mxu1 %v177_v16 }
  0x12   :  { %577 = vmatpush3.bf16.msra.mxu0 %v652_v5  ;;  %601 = vmatpush3.msra.mxu1 %v177_v16 }
  0x13   :  { %578 = vmatprep.subr.bf16.mxu0 %v665_v0  ;;  %602 = vmatprep.subr.mxu1 %v176_v17 }
  0x14   :  { %603 = vmatpush3.msra.mxu1 %v176_v17 }
  0x15   :  { %607 = vmatprep.subr.mxu1 %v281_v18 }
  0x16   :  { %579 = vmatpush3.bf16.msra.mxu0 %v653_v6 }
  0x17   :  { %580 = vmatprep.subr.bf16.mxu0 %v665_v0 }
  0x1a   :  { %581 = vmatpush3.bf16.msra.mxu0 %v654_v7 }
  0x1b   :  { %582 = vmatprep.subr.bf16.mxu0 %v665_v0  ;;  %v526_v0 = vld [vmem:[%s873_s8] ss:$0 sm:$0xff] }
  0x1e   :  { %583 = vmatpush3.bf16.msra.mxu0 %v655_v8 }
  0x1f   :  { %626 = vmatprep.subr.mxu0 %v379_v41 }
  0x21   :  { %585 = vmatmul.mubr.bf16.vlgmr.msra.gmra.mxu0 %v656_v9 }
  0x22   :  { %627 = vmatpush3.msra.mxu0 %v379_v41 }
  0x23   :  { %628 = vmatprep.subr.mxu0 %v378_v42 }
  0x24   :  { %629 = vmatpush3.msra.mxu0 %v378_v42 }
  0x25   :  { %630 = vmatprep.subr.mxu0 %v377_v43 }
  0x26   :  { %631 = vmatpush3.msra.mxu0 %v377_v43 }
  0x27   :  { %632 = vmatprep.subr.mxu0 %v376_v44 }
  0x28   :  { %633 = vmatpush3.msra.mxu0 %v376_v44 }
  0x29   :  { %634 = vmatprep.subr.mxu0 %v375_v52 }
  0x2a   :  { %635 = vmatpush3.msra.mxu0 %v375_v52 }
  0x2b   :  { %636 = vmatprep.subr.mxu0 %v374_v53 }
  0x2c   :  { %637 = vmatpush3.msra.mxu0 %v374_v53 }
  0x2d   :  { %638 = vmatprep.subr.mxu0 %v373_v54 }
  0x2e   :  { %639 = vmatpush3.msra.mxu0 %v373_v54 }
  0x2f   :  { %640 = vmatprep.subr.mxu0 %v372_v55 }
  0x30   :  { %641 = vmatpush3.msra.mxu0 %v372_v55 }
  0xe1   :  { %v148_v20 = vpop.f32.mrf.mxu0 }
  0xe2   :  { %v155_v21 = vadd.f32 %v148_v20, %v40_v19 }
  0xe3   :  { %v586_v22 = vpop.f32.mrf.mxu0 }
  0xe4   :  { %158 = vst.msk [vmem:[#allocation2] sm:$0xff] %vm37_vm0, %v155_v21 }
  0xe5   :  { %v151_v24 = vpop.f32.mrf.mxu0 }
  0xe6   :  { %v156_v25 = vadd.f32 %v151_v24, %v41_v23 }
  0xe7   :  { %v587_v26 = vpop.f32.mrf.mxu0 }
  0xe8   :  { %159 = vst.msk [vmem:[#allocation2 + $0x8] sm:$0xff] %vm37_vm0, %v156_v25 }
  0xeb   :  { %v163_v28 = vld [vmem:[#allocation2] sm:$0xff] }
  0xec   :  { %v779_v29 = vadd.f32 %v519_v27, %v163_v28 }
  0xee   :  { %v174_v30 = vmax.f32 %v779_v29, 0.0 }
  0xef   :  { %v164_v31 = vld [vmem:[#allocation2 + $0x8] sm:$0xff] }
  0xf0   :  { %v782_v32 = vadd.f32 %v519_v27, %v164_v31  ;;  %604 = vmatprep.mubr.msk.f32.mxu1 %vm37_vm0, %v174_v30 }
  0xf2   :  { %v175_v33 = vmax.f32 %v782_v32, 0.0 }
  0xf4   :  { %605 = vmatmul.mubr.msk.f32.vlgmr.msra.gmra.mxu1 %vm37_vm0, %v175_v33 }
  0xf5   :  { %608 = vmatpush3.msra.mxu1 %v281_v18 }
  0xf6   :  { %609 = vmatprep.subr.mxu1 %v280_v34 }
  0xf7   :  { %610 = vmatpush3.msra.mxu1 %v280_v34 }
  0xf8   :  { %611 = vmatprep.subr.mxu1 %v279_v35 }
  0xf9   :  { %612 = vmatpush3.msra.mxu1 %v279_v35 }
  0xfa   :  { %613 = vmatprep.subr.mxu1 %v278_v36 }
  0xfb   :  { %614 = vmatpush3.msra.mxu1 %v278_v36 }
  0xfc   :  { %615 = vmatprep.subr.mxu1 %v277_v37 }
  0xfd   :  { %616 = vmatpush3.msra.mxu1 %v277_v37 }
  0xfe   :  { %617 = vmatprep.subr.mxu1 %v276_v38 }
  0xff   :  { %618 = vmatpush3.msra.mxu1 %v276_v38 }
 0x100   :  { %619 = vmatprep.subr.mxu1 %v275_v39 }
 0x101   :  { %620 = vmatpush3.msra.mxu1 %v275_v39 }
 0x102   :  { %621 = vmatprep.subr.mxu1 %v274_v40 }
 0x103   :  { %622 = vmatpush3.msra.mxu1 %v274_v40 }
 0x1b4   :  { %v606_v46 = vpop.f32.mrf.mxu1 }
 0x1b5   :  { %v269_v47 = vadd.f32 %v606_v46, %v520_v45 }
 0x1b6   :  { %v263_v48 = vpop.f32.mrf.mxu1 }
 0x1b7   :  { %v264_v49 = vadd.f32 %v520_v45, %v263_v48  ;;  %v273_v51 = vmax.f32 %v269_v47, 0.0 }
 0x1b9   :  { %v272_v50 = vmax.f32 %v264_v49, 0.0 }
 0x1bb   :  { %623 = vmatprep.mubr.msk.f32.mxu1 %vm37_vm0, %v272_v50 }
 0x1bc   :  { %624 = vmatmul.mubr.msk.f32.vlgmr.msra.gmra.mxu1 %vm37_vm0, %v273_v51 }
 0x27c   :  { %v625_v57 = vpop.f32.mrf.mxu1 }
 0x27d   :  { %v367_v58 = vadd.f32 %v625_v57, %v523_v56 }
 0x27e   :  { %v361_v59 = vpop.f32.mrf.mxu1 }
 0x27f   :  { %v362_v60 = vadd.f32 %v523_v56, %v361_v59  ;;  %v371_v62 = vmax.f32 %v367_v58, 0.0 }
 0x281   :  { %v370_v61 = vmax.f32 %v362_v60, 0.0 }
 0x283   :  { %642 = vmatprep.mubr.msk.f32.mxu0 %vm37_vm0, %v370_v61 }
 0x284   :  { %643 = vmatmul.mubr.msk.f32.vlgmr.msra.gmra.mxu0 %vm37_vm0, %v371_v62 }
 0x344   :  { %v644_v63 = vpop.f32.mrf.mxu0 }
 0x345   :  { %v465_v3 = vadd.f32 %v644_v63, %v526_v0 }
 0x346   :  { %v459_v1 = vpop.f32.mrf.mxu0 }
 0x347   :  { %v460_v2 = vadd.f32 %v526_v0, %v459_v1  ;;  %v471_v5 = vsel %vm37_vm0, %v465_v3, -inf }
 0x349   :  { %v468_v4 = vsel %vm37_vm0, %v460_v2, -inf }
 0x34a   :  { %469 = vmax.xlane.f32.xlu0 %v468_v4 }
 0x34e   :  { %472 = vmax.xlane.f32.xlu0 %v471_v5 }
 0x3d3   :  { %v470_v6 = vpop.xlane.xlu0 %469 }
 0x3d4   :  { %v474_v7 = vsub.f32 %v460_v2, %v470_v6 }
 0x3d6   :  { %v476_v8 = vmul.f32 1.442695, %v474_v7 }
 0x3d7   :  { %v473_v9 = vpop.xlane.xlu0 %472 }
 0x3d8   :  { %657 = vpow2.f32 %v476_v8  ;;  %v475_v10 = vsub.f32 %v465_v3, %v473_v9 }
 0x3da   :  { %v478_v11 = vmul.f32 1.442695, %v475_v10 }
 0x3dc   :  { %659 = vpow2.f32 %v478_v11 }
 0x3e5   :  { %v658_v12 = vpop.eup %657 }
 0x3e6   :  { %v480_v13 = vsel %vm37_vm0, %v658_v12, 0.0 }
 0x3e7   :  { %481 = vadd.xlane.f32.xlu1 %v480_v13 }
 0x3e9   :  { %v660_v14 = vpop.eup %659 }
 0x3ea   :  { %v483_v15 = vsel %vm37_vm0, %v660_v14, 0.0 }
 0x3eb   :  { %484 = vadd.xlane.f32.xlu1 %v483_v15 }
 0x470   :  { %v482_v16 = vpop.xlane.xlu1 %481 }
 0x471   :  { %661 = vlog2.f32 %v482_v16 }
 0x474   :  { %v485_v17 = vpop.xlane.xlu1 %484 }
 0x475   :  { %663 = vlog2.f32 %v485_v17 }
 0x47e   :  { %v662_v18 = vpop.eup %661 }
 0x47f   :  { %v487_v19 = vmul.f32 0.6931472, %v662_v18 }
 0x481   :  { %v490_v20 = vadd.f32 %v487_v19, %v470_v6 }
 0x482   :  { %v664_v21 = vpop.eup %663 }
 0x483   :  { %v489_v22 = vmul.f32 0.6931472, %v664_v21  ;;  %v492_v23 = vsub.f32 %v460_v2, %v490_v20 }
 0x485   :  { %496 = vrot.lane.b32.xlu0 %v492_v23, %s667_s6  ;;  %v491_v24 = vadd.f32 %v489_v22, %v473_v9 }
 0x487   :  { %v493_v25 = vsub.f32 %v465_v3, %v491_v24 }
 0x489   :  { %498 = vrot.lane.b32.xlu1 %v493_v25, %s667_s6 }
 0x4f7   :  { %v497_v26 = vpop.permute.xlu0 %496 }
 0x4f8   :  { %v502_v27 = vsel %vm37_vm0, %v174_v30, %v497_v26 }
 0x4f9   :  { %504 = vst [vmem:[%s874_s9] sm:$0xff] %v502_v27 }
 0x4fb   :  { %v499_v28 = vpop.permute.xlu1 %498 }
 0x4fc   :  { %v503_v31 = vsel %vm37_vm0, %v175_v33, %v499_v28 }
 0x4fd   :  { %505 = vst [vmem:[%s874_s9 + $0x8] sm:$0xff] %v503_v31 }

</bundles_post_ra>
